<compile_context>
chip_gen: v7x
topology: tpu7x:2x2x1
jax: 0.10.0
libtpu: 0.0.40
codegen_flags: <defaults>
</compile_context>

<pallas_src>
import jax
import jax.numpy as jnp
from jax.experimental import pallas as pl
from jax.experimental.pallas import tpu as pltpu


def dqn_kernel(x_ref, w1_ref, b1_ref, w2_ref, b2_ref, w3_ref, b3_ref, o_ref):
    # x_ref: (TB, state_size) natural-layout tile. Transpose in-kernel so batch lives
    # on the 128-lane axis: every matmul result, VPU op and the output store are
    # lane-dense. Transpose in f32 (universally supported), then cast for the MXU.
    xt = x_ref[...].T.astype(w1_ref.dtype)                     # (state_size, TB)

    # fc1 + ReLU (MXU in compute dtype, f32 accumulate; bias/ReLU on VPU in f32)
    h1 = jnp.dot(w1_ref[...], xt, preferred_element_type=jnp.float32)
    h1 = jnp.maximum(h1 + b1_ref[...], 0.0)                    # (64, TB)

    # fc2 + ReLU
    h2 = jnp.dot(w2_ref[...], h1.astype(w2_ref.dtype), preferred_element_type=jnp.float32)
    h2 = jnp.maximum(h2 + b2_ref[...], 0.0)                    # (64, TB)

    # fc3 (no activation); output rows padded to a full sublane tile.
    out = jnp.dot(w3_ref[...], h2.astype(w3_ref.dtype), preferred_element_type=jnp.float32)
    o_ref[...] = (out + b3_ref[...]).astype(o_ref.dtype)       # (a_pad, TB), lane-dense store


def dqn_reference(x, params):
    w1, b1, w2, b2, w3, b3 = params
    h1 = jnp.maximum(x @ w1.T + b1.T, 0.0)
    h2 = jnp.maximum(h1 @ w2.T + b2.T, 0.0)
    return h2 @ w3.T + b3.T


def dqn_forward(x, params, *, tb=8192, compute_dtype=jnp.bfloat16, xla_fallback_batch=0):
    """x: (B, state_size). params in PyTorch layout: W (out_features, in_features), b (out, 1)."""
    w1, b1, w2, b2, w3, b3 = params
    B, state_size = x.shape
    action_size = w3.shape[0]

    # Tiny action-selection batches (B << 128) pad 94% of the lane axis; the plain
    # XLA path is faster there. Opt in explicitly so tests still exercise the kernel.
    if B <= xla_fallback_batch:
        return dqn_reference(x, params)

    # ---- batch tile selection -------------------------------------------------
    # Big enough to amortize the ~0.35 us per-grid-step overhead, capped by `tb`;
    # for batches > 256 keep at least 2 tiles so v7x megacore can split the
    # "parallel" axis across both TensorCores.
    target = pl.cdiv(B, 2) if B > 256 else B
    TB = min(tb, max(128, pl.next_power_of_2(target)))
    TB = max(128, (TB // 128) * 128)                    # lane-width multiple
    n_tiles = pl.cdiv(B, TB)                            # ragged last block -> Pallas OOB masking

    # ---- pad output feature dim to a full sublane tile (8) ---------------------
    a_pad = max(8, ((action_size + 7) // 8) * 8)
    if a_pad != action_size:
        w3 = jnp.pad(w3, ((0, a_pad - action_size), (0, 0)))
        b3 = jnp.pad(b3, ((0, a_pad - action_size), (0, 0)))

    # Weights are tiny and VMEM-resident; cast once for the MXU. Biases stay f32.
    w1c, w2c, w3c = (w.astype(compute_dtype) for w in (w1, w2, w3))

    # ---- explicit VMEM budget ---------------------------------------------------
    lanes = ((max(state_size, 128) + 127) // 128) * 128
    vmem_est = 4 * (2 * TB * lanes        # x tile (lane-padded), double-buffered
                    + 2 * TB * a_pad      # output tile, double-buffered
                    + 3 * TB * 64)        # x^T / h1 / h2 temporaries
    vmem_limit = int(min(max(2 * vmem_est, 32 * 1024 * 1024), 48 * 1024 * 1024))

    def resident(arr):
        # Constant index_map -> fetched once, stays VMEM-resident across grid steps.
        return pl.BlockSpec(arr.shape, lambda i: (0, 0))

    out_t = pl.pallas_call(
        dqn_kernel,
        out_shape=jax.ShapeDtypeStruct((a_pad, B), jnp.float32),
        grid=(n_tiles,),
        in_specs=[
            pl.BlockSpec((TB, state_size), lambda i: (i, 0)),   # x streams per grid step
            resident(w1c), resident(b1),
            resident(w2c), resident(b2),
            resident(w3c), resident(b3),
        ],
        out_specs=pl.BlockSpec((a_pad, TB), lambda i: (0, i)),  # lane-dense output block
        compiler_params=pltpu.CompilerParams(
            dimension_semantics=("parallel",),                  # shard tiles across TCs on v7x
            vmem_limit_bytes=vmem_limit),
    )(x, w1c, b1, w2c, b2, w3c, b3)

    # (a_pad, B) -> (B, action_size). Only the 8-row output is relayouted (small),
    # the full x array is never rewritten in HBM.
    return jnp.transpose(out_t)[:, :action_size]


def init_params(key, state_size, action_size):
    """Deterministic init mimicking PyTorch nn.Linear (uniform +/- 1/sqrt(fan_in)).
    Weights in PyTorch layout (out_features, in_features); biases as (out, 1) columns."""
    def linear(k, fan_in, fan_out):
        kw, kb = jax.random.split(k)
        bound = 1.0 / jnp.sqrt(jnp.float32(fan_in))
        w = jax.random.uniform(kw, (fan_out, fan_in), jnp.float32, -bound, bound)
        b = jax.random.uniform(kb, (fan_out, 1), jnp.float32, -bound, bound)
        return w, b

    k1, k2, k3 = jax.random.split(key, 3)
    w1, b1 = linear(k1, state_size, 64)
    w2, b2 = linear(k2, 64, 64)
    w3, b3 = linear(k3, 64, action_size)
    return (w1, b1, w2, b2, w3, b3)


if __name__ == "__main__":
    state_size = 16
    action_size = 4

    key = jax.random.PRNGKey(0)
    kx, kp, kx2 = jax.random.split(key, 3)
    params = init_params(kp, state_size, action_size)

    # 1) Small single-env batch, f32 compute path -> tight tolerance. Also exercises
    #    a block larger than the batch (OOB-masked writes).
    x = jax.random.normal(kx, (8, state_size), jnp.float32)
    out = jax.block_until_ready(dqn_forward(x, params, compute_dtype=jnp.float32))
    ref = dqn_reference(x, params)
    assert out.shape == (8, action_size)
    assert jnp.allclose(out, ref, atol=1e-5, rtol=1e-5), "mismatch vs reference (B=8, f32)"

    # 2) Multi-tile ragged batch with the default bf16-streaming path: exercises
    #    >1 grid step, the ragged last block, and the padded fc3 rows.
    x2 = jax.random.normal(kx2, (300, state_size), jnp.float32)
    out2 = jax.block_until_ready(dqn_forward(x2, params))
    ref2 = dqn_reference(x2, params)
    assert out2.shape == (300, action_size)
    max_err = float(jnp.max(jnp.abs(out2 - ref2)))
    assert max_err < 5e-2, f"mismatch vs reference (B=300, bf16): max abs err {max_err}"

    print("KERNEL_OK")
</pallas_src>

<mosaic_0001>
module attributes {stable_mosaic.version = 11 : i64} {
  func.func @dqn_kernel(%arg0: i32, %arg1: memref<128x16xf32, #tpu.memory_space<vmem>>, %arg2: memref<64x16xf32, #tpu.memory_space<vmem>>, %arg3: memref<64x1xf32, #tpu.memory_space<vmem>>, %arg4: memref<64x64xf32, #tpu.memory_space<vmem>>, %arg5: memref<64x1xf32, #tpu.memory_space<vmem>>, %arg6: memref<8x64xf32, #tpu.memory_space<vmem>>, %arg7: memref<8x1xf32, #tpu.memory_space<vmem>>, %arg8: memref<8x128xf32, #tpu.memory_space<vmem>>) attributes {dimension_semantics = [#tpu.dimension_semantics<parallel>], iteration_bounds = array<i64: 1>, scalar_prefetch = 0 : i64, scratch_operands = 0 : i64, tpu.core_type = #tpu.core_type<tc>, window_params = [{transform_indices = @transform_0, window_bounds = array<i64: 128, 16>}, {pipeline_mode = #tpu.pipeline_mode<synchronous>, transform_indices = @transform_1, window_bounds = array<i64: 64, 16>}, {pipeline_mode = #tpu.pipeline_mode<synchronous>, transform_indices = @transform_2, window_bounds = array<i64: 64, 1>}, {pipeline_mode = #tpu.pipeline_mode<synchronous>, transform_indices = @transform_3, window_bounds = array<i64: 64, 64>}, {pipeline_mode = #tpu.pipeline_mode<synchronous>, transform_indices = @transform_4, window_bounds = array<i64: 64, 1>}, {pipeline_mode = #tpu.pipeline_mode<synchronous>, transform_indices = @transform_5, window_bounds = array<i64: 8, 64>}, {pipeline_mode = #tpu.pipeline_mode<synchronous>, transform_indices = @transform_6, window_bounds = array<i64: 8, 1>}, {transform_indices = @transform_7, window_bounds = array<i64: 8, 128>}]} {
    %c0 = arith.constant 0 : index
    %c0_0 = arith.constant 0 : index
    %0 = vector.load %arg1[%c0, %c0_0] : memref<128x16xf32, #tpu.memory_space<vmem>>, vector<128x16xf32>
    %1 = tpu.transpose %0, [1, 0] : vector<128x16xf32> -> vector<16x128xf32>
    %c0_1 = arith.constant 0 : index
    %c0_2 = arith.constant 0 : index
    %2 = vector.load %arg2[%c0_1, %c0_2] : memref<64x16xf32, #tpu.memory_space<vmem>>, vector<64x16xf32>
    %cst = arith.constant dense<0.000000e+00> : vector<64x128xf32>
    %3 = tpu.matmul %2, %1, %cst {dimension_numbers = #tpu.dot_dimension_numbers<[1], [0], [0], [1], [0, 0, 1, 1], [], []>} : vector<64x16xf32>, vector<16x128xf32>, vector<64x128xf32> -> vector<64x128xf32>
    %c0_3 = arith.constant 0 : index
    %c0_4 = arith.constant 0 : index
    %4 = vector.load %arg3[%c0_3, %c0_4] : memref<64x1xf32, #tpu.memory_space<vmem>>, vector<64x1xf32>
    %5 = vector.broadcast %4 : vector<64x1xf32> to vector<64x128xf32>
    %6 = arith.addf %3, %5 : vector<64x128xf32>
    %cst_5 = arith.constant 0.000000e+00 : f32
    %7 = vector.broadcast %cst_5 : f32 to vector<64x128xf32>
    %8 = arith.maximumf %6, %7 : vector<64x128xf32>
    %c0_6 = arith.constant 0 : index
    %c0_7 = arith.constant 0 : index
    %9 = vector.load %arg4[%c0_6, %c0_7] : memref<64x64xf32, #tpu.memory_space<vmem>>, vector<64x64xf32>
    %cst_8 = arith.constant dense<0.000000e+00> : vector<64x128xf32>
    %10 = tpu.matmul %9, %8, %cst_8 {dimension_numbers = #tpu.dot_dimension_numbers<[1], [0], [0], [1], [0, 0, 1, 1], [], []>} : vector<64x64xf32>, vector<64x128xf32>, vector<64x128xf32> -> vector<64x128xf32>
    %c0_9 = arith.constant 0 : index
    %c0_10 = arith.constant 0 : index
    %11 = vector.load %arg5[%c0_9, %c0_10] : memref<64x1xf32, #tpu.memory_space<vmem>>, vector<64x1xf32>
    %12 = vector.broadcast %11 : vector<64x1xf32> to vector<64x128xf32>
    %13 = arith.addf %10, %12 : vector<64x128xf32>
    %cst_11 = arith.constant 0.000000e+00 : f32
    %14 = vector.broadcast %cst_11 : f32 to vector<64x128xf32>
    %15 = arith.maximumf %13, %14 : vector<64x128xf32>
    %c0_12 = arith.constant 0 : index
    %c0_13 = arith.constant 0 : index
    %16 = vector.load %arg6[%c0_12, %c0_13] : memref<8x64xf32, #tpu.memory_space<vmem>>, vector<8x64xf32>
    %cst_14 = arith.constant dense<0.000000e+00> : vector<8x128xf32>
    %17 = tpu.matmul %16, %15, %cst_14 {dimension_numbers = #tpu.dot_dimension_numbers<[1], [0], [0], [1], [0, 0, 1, 1], [], []>} : vector<8x64xf32>, vector<64x128xf32>, vector<8x128xf32> -> vector<8x128xf32>
    %c0_15 = arith.constant 0 : index
    %c0_16 = arith.constant 0 : index
    %18 = vector.load %arg7[%c0_15, %c0_16] : memref<8x1xf32, #tpu.memory_space<vmem>>, vector<8x1xf32>
    %19 = vector.broadcast %18 : vector<8x1xf32> to vector<8x128xf32>
    %20 = arith.addf %17, %19 : vector<8x128xf32>
    %c0_17 = arith.constant 0 : index
    %c0_18 = arith.constant 0 : index
    %21 = vector.load %arg8[%c0_17, %c0_18] : memref<8x128xf32, #tpu.memory_space<vmem>>, vector<8x128xf32>
    tpu.vector_store %arg8[%c0_17, %c0_18], %20 {strides = array<i32>} : memref<8x128xf32, #tpu.memory_space<vmem>>, vector<8x128xf32>,
    return
  }
  func.func @transform_0(%arg0: i32) -> (i32, i32) {
    %c0_i32 = arith.constant 0 : i32
    %c0_i32_0 = arith.constant 0 : i32
    return %arg0, %c0_i32 : i32, i32
  }
  func.func @transform_1(%arg0: i32) -> (i32, i32) {
    %c0_i32 = arith.constant 0 : i32
    %c0_i32_0 = arith.constant 0 : i32
    %c0_i32_1 = arith.constant 0 : i32
    return %c0_i32, %c0_i32_0 : i32, i32
  }
  func.func @transform_2(%arg0: i32) -> (i32, i32) {
    %c0_i32 = arith.constant 0 : i32
    %c0_i32_0 = arith.constant 0 : i32
    %c0_i32_1 = arith.constant 0 : i32
    return %c0_i32, %c0_i32_0 : i32, i32
  }
  func.func @transform_3(%arg0: i32) -> (i32, i32) {
    %c0_i32 = arith.constant 0 : i32
    %c0_i32_0 = arith.constant 0 : i32
    %c0_i32_1 = arith.constant 0 : i32
    return %c0_i32, %c0_i32_0 : i32, i32
  }
  func.func @transform_4(%arg0: i32) -> (i32, i32) {
    %c0_i32 = arith.constant 0 : i32
    %c0_i32_0 = arith.constant 0 : i32
    %c0_i32_1 = arith.constant 0 : i32
    return %c0_i32, %c0_i32_0 : i32, i32
  }
  func.func @transform_5(%arg0: i32) -> (i32, i32) {
    %c0_i32 = arith.constant 0 : i32
    %c0_i32_0 = arith.constant 0 : i32
    %c0_i32_1 = arith.constant 0 : i32
    return %c0_i32, %c0_i32_0 : i32, i32
  }
  func.func @transform_6(%arg0: i32) -> (i32, i32) {
    %c0_i32 = arith.constant 0 : i32
    %c0_i32_0 = arith.constant 0 : i32
    %c0_i32_1 = arith.constant 0 : i32
    return %c0_i32, %c0_i32_0 : i32, i32
  }
  func.func @transform_7(%arg0: i32) -> (i32, i32) {
    %c0_i32 = arith.constant 0 : i32
    %c0_i32_0 = arith.constant 0 : i32
    return %c0_i32, %arg0 : i32, i32
  }
}

</mosaic_0001>

<bundles_post_ra>
// kernel: tpu_custom_call.1
= control target key start
LH: loop header
LB: loop body
LE: loop exit
PB: predicated region body
PF: predicated region fallthrough
CT: control target
= control target key end

     0   :  { %vm99_vm0 = vcmask 130048   ;;  %v854_v6 = vmov 0   ;;  %s1116_s0 = inlined_call_operand.vmem [shape: f32[8,16], index: 0, kind: input, shape index: {}]   ;;  %s1117_s1 = inlined_call_operand.vmem [shape: f32[64,16], index: 1, kind: input, shape index: {}]   ;;  %s1118_s2 = inlined_call_operand.vmem [shape: f32[64,1], index: 2, kind: input, shape index: {}]   ;;  %s1119_s3 = inlined_call_operand.vmem [shape: f32[64,64], index: 3, kind: input, shape index: {}]   ;;  %s1120_s4 = inlined_call_operand.vmem [shape: f32[64,1], index: 4, kind: input, shape index: {}]   ;;  %s1121_s5 = inlined_call_operand.vmem [shape: f32[8,64], index: 5, kind: input, shape index: {}]   ;;  %s1122_s6 = inlined_call_operand.vmem [shape: f32[8,1], index: 6, kind: input, shape index: {}]   ;;  %s1123_s7 = inlined_call_operand.hbm [shape: f32[8,8], index: 7, kind: output, shape index: {}]  }
   0x1   :  { %v27_v0 = vld [vmem:[%s1116_s0] sm:$0xff]  ;;  %v28_v1 = vld [vmem:[%s1116_s0 + $0x8] sm:$0xff]  ;;  %v29_v2 = vld [vmem:[%s1116_s0 + $0x10] sm:$0xff]  ;;  %828 = vset.pattern.permute.xlu0 %v854_v6  ;;  %829 = vset.pattern.permute.xlu1 %v854_v6 }
   0x2   :  { %v747_v3 = vpack.c.bf16 %v28_v1, %v27_v0  ;;  %vm910_vm1 = vmpackc.low %vm99_vm0, %vm99_vm0  ;;  %v30_v5 = vld [vmem:[%s1116_s0 + $0x18] sm:$0xff]  ;;  %v43_v8 = vld [vmem:[%s1117_s1] sm:$0xff] }
   0x3   :  { %v753_v7 = vpack.c.bf16 %v30_v5, %v29_v2  ;;  %v31_v9 = vld [vmem:[%s1116_s0 + $0x20] sm:$0xff]  ;;  %v32_v10 = vld [vmem:[%s1116_s0 + $0x28] sm:$0xff]  ;;  %688 = vmatprep.mubr.msk.f32.mxu0 %vm99_vm0, %v43_v8  ;;  %v53_v13 = vld [vmem:[%s1118_s2 + $0x10] sm:$0xff] }
   0x4   :  { %749 = vmatprep.subr.msk.bf16.mxu0 %vm910_vm1, %v747_v3  ;;  %v51_v11 = vld [vmem:[%s1118_s2] sm:$0xff]  ;;  %v759_v12 = vpack.c.bf16 %v32_v10, %v31_v9  ;;  %v52_v14 = vld [vmem:[%s1118_s2 + $0x8] sm:$0xff]  ;;  %71 = vperm.xlu1 %829, %v53_v13   ;;  %v54_v15 = vld [vmem:[%s1118_s2 + $0x18] sm:$0xff] }
   0x5   :  { %752 = vmatpush3.bf16.xpose.msk.msra.mxu0 %vm910_vm1, %v747_v3  ;;  %61 = vperm.xlu0 %828, %v51_v11   ;;  %v33_v16 = vld [vmem:[%s1116_s0 + $0x30] sm:$0xff]  ;;  %v34_v17 = vld [vmem:[%s1116_s0 + $0x38] sm:$0xff]  ;;  %v55_v18 = vld [vmem:[%s1118_s2 + $0x20] sm:$0xff] }
   0x6   :  { %755 = vmatprep.subr.msk.bf16.mxu0 %vm910_vm1, %v753_v7 }
   0x8   :  { %76 = vperm.xlu1 %829, %v54_v15  }
   0x9   :  { %66 = vperm.xlu0 %828, %v52_v14  }
   0xd   :  { %758 = vmatpush3.bf16.xpose.msk.msra.mxu0 %vm910_vm1, %v753_v7 }
   0xe   :  { %761 = vmatprep.subr.msk.bf16.mxu0 %vm910_vm1, %v759_v12 }
   0xf   :  { %12 = vsyncpa [#allocation3], 0  ;;  %v56_v19 = vld [vmem:[%s1118_s2 + $0x28] sm:$0xff]  ;;  %v765_v20 = vpack.c.bf16 %v34_v17, %v33_v16  ;;  %81 = vperm.xlu0 %828, %v55_v18   ;;  %v57_v21 = vld [vmem:[%s1118_s2 + $0x30] sm:$0xff]  ;;  %vm341_vm2 = vcmask 523264   ;;  %vm856_vm3 = vmmov 0  }
  0x10   :  { %86 = vperm.xlu1 %829, %v56_v19   ;;  %v58_v22 = vld [vmem:[%s1118_s2 + $0x38] sm:$0xff]  ;;  %v35_v23 = vld [vmem:[%s1116_s0 + $0x40] sm:$0xff]  ;;  %v36_v24 = vld [vmem:[%s1116_s0 + $0x48] sm:$0xff]  ;;  %s858_s22 = smov [#allocation2]  }
  0x11   :  { %v293_v25 = vld [vmem:[%s1120_s4] sm:$0xff]  ;;  %v294_v26 = vld [vmem:[%s1120_s4 + $0x8] sm:$0xff]  ;;  %v771_v27 = vpack.c.bf16 %v36_v24, %v35_v23  ;;  %v295_v28 = vld [vmem:[%s1120_s4 + $0x10] sm:$0xff] }
  0x12   :  { %v296_v29 = vld [vmem:[%s1120_s4 + $0x18] sm:$0xff]  ;;  %v37_v30 = vld [vmem:[%s1116_s0 + $0x50] sm:$0xff]  ;;  %v297_v32 = vld [vmem:[%s1120_s4 + $0x20] sm:$0xff] }
  0x13   :  { %91 = vperm.xlu0 %828, %v57_v21   ;;  %v38_v31 = vld [vmem:[%s1116_s0 + $0x58] sm:$0xff]  ;;  %v298_v33 = vld [vmem:[%s1120_s4 + $0x28] sm:$0xff]  ;;  %v299_v35 = vld [vmem:[%s1120_s4 + $0x30] sm:$0xff] }
  0x14   :  { %96 = vperm.xlu1 %829, %v58_v22   ;;  %v777_v34 = vpack.c.bf16 %v38_v31, %v37_v30  ;;  %v300_v36 = vld [vmem:[%s1120_s4 + $0x38] sm:$0xff]  ;;  %v39_v37 = vld [vmem:[%s1116_s0 + $0x60] sm:$0xff]  ;;  %v40_v38 = vld [vmem:[%s1116_s0 + $0x68] sm:$0xff]  ;;  %v855_v31 = vmov 0.0|0.0  }
  0x15   :  { %764 = vmatpush3.bf16.xpose.msk.msra.mxu0 %vm910_vm1, %v759_v12  ;;  %v480_v39 = vld [vmem:[%s1122_s6] sm:$0xff]  ;;  %v783_v40 = vpack.c.bf16 %v40_v38, %v39_v37  ;;  %v41_v41 = vld [vmem:[%s1116_s0 + $0x70] sm:$0xff]  ;;  %v42_v42 = vld [vmem:[%s1116_s0 + $0x78] sm:$0xff]  ;;  %s566_s0 = sshll.u32 %s858_s22, 4  ;;  %s567_s0 = int_to_ptr.vmem [resolvable:$true] %s566_s0 }
  0x16   :  { %767 = vmatprep.subr.msk.bf16.mxu0 %vm910_vm1, %v765_v20  ;;  %v789_v43 = vpack.c.bf16 %v42_v42, %v41_v41  ;;  %v44_v44 = vld [vmem:[%s1117_s1 + $0x8] sm:$0xff]  ;;  %v45_v45 = vld [vmem:[%s1117_s1 + $0x10] sm:$0xff]  ;;  %v46_v46 = vld [vmem:[%s1117_s1 + $0x18] sm:$0xff]  ;;  %s830_s23 = scalar_lea.vmem %s567_s0, 128  ;;  %p835_p1 = scmp.lt.s32.totalorder %s567_s0, %s567_s0 }
  0x17   :  { %303 = vperm.xlu0 %828, %v293_v25   ;;  %v47_v47 = vld [vmem:[%s1117_s1 + $0x20] sm:$0xff]  ;;  %v48_v48 = vld [vmem:[%s1117_s1 + $0x28] sm:$0xff]  ;;  %v49_v49 = vld [vmem:[%s1117_s1 + $0x30] sm:$0xff]  ;;  %p831_p0 = scmp.ne.s32.totalorder %s567_s0, %s830_s23  ;;  %p836_p2 = scmp.lt.s32.totalorder %s830_s23, %s830_s23 }
  0x18   :  { %308 = vperm.xlu1 %829, %v294_v26   ;;  %v50_v50 = vld [vmem:[%s1117_s1 + $0x38] sm:$0xff]  ;;  %v285_v51 = vld [vmem:[%s1119_s3] sm:$0xff]  ;;  %v286_v24 = vld [vmem:[%s1119_s3 + $0x8] sm:$0xff] }
  0x19   :  { %716 = vmatprep.mubr.msk.f32.mxu1 %vm341_vm2, %v285_v51  ;;  %v287_v25 = vld [vmem:[%s1119_s3 + $0x10] sm:$0xff]  ;;  %v288_v26 = vld [vmem:[%s1119_s3 + $0x18] sm:$0xff]  ;;  %p837_p3 = por %p836_p2, %p835_p1 }
  0x1a   :  { %v292_v30 = vld [vmem:[%s1119_s3 + $0x38] sm:$0xff] }
  0x1b   :  { %313 = vperm.xlu0 %828, %v295_v28   ;;  %v290_v28 = vld [vmem:[%s1119_s3 + $0x28] sm:$0xff]  ;;  %p838_p4 = pnand %p837_p3, %p831_p0 }
  0x1c   :  { %318 = vperm.xlu1 %829, %v296_v29   ;;  %v291_v29 = vld [vmem:[%s1119_s3 + $0x30] sm:$0xff] }
  0x1d   :  { %770 = vmatpush3.bf16.xpose.msk.msra.mxu0 %vm910_vm1, %v765_v20 }
  0x1e   :  { %773 = vmatprep.subr.msk.bf16.mxu0 %vm910_vm1, %v771_v27 }
  0x1f   :  { %323 = vperm.xlu0 %828, %v297_v32   ;;  %v857_v32 = vmov 0.0  }
  0x20   :  { %328 = vperm.xlu1 %829, %v298_v33  }
  0x23   :  { %333 = vperm.xlu0 %828, %v299_v35  }
  0x24   :  { %338 = vperm.xlu1 %829, %v300_v36  }
  0x25   :  { %776 = vmatpush3.bf16.xpose.msk.msra.mxu0 %vm910_vm1, %v771_v27  ;;  %v289_v27 = vld [vmem:[%s1119_s3 + $0x20] sm:$0xff] }
  0x26   :  { %779 = vmatprep.subr.msk.bf16.mxu0 %vm910_vm1, %v777_v34 }
  0x27   :  { %483 = vperm.xlu0 %828, %v480_v39  }
  0x2d   :  { %782 = vmatpush3.bf16.xpose.msk.msra.mxu0 %vm910_vm1, %v777_v34 }
  0x2e   :  { %785 = vmatprep.subr.msk.bf16.mxu0 %vm910_vm1, %v783_v40 }
  0x35   :  { %788 = vmatpush3.bf16.xpose.msk.msra.mxu0 %vm910_vm1, %v783_v40 }
  0x36   :  { %791 = vmatprep.subr.msk.bf16.mxu0 %vm910_vm1, %v789_v43 }
  0x3d   :  { %794 = vmatpush3.bf16.xpose.msk.msra.mxu0 %vm910_vm1, %v789_v43 }
  0x44   :  { %689 = vmatmul.mubr.msk.f32.vlgmr.msra.gmra.mrb[0].mxu0 %vm99_vm0, %v44_v44 }
  0x45   :  { %691 = vmatprep.mubr.msk.f32.mxu0 %vm99_vm0, %v45_v45 }
  0x48   :  { %692 = vmatmul.mubr.msk.f32.gmra.mrb[2].mxu0 %vm99_vm0, %v46_v46 }
  0x49   :  { %694 = vmatprep.mubr.msk.f32.mxu0 %vm99_vm0, %v47_v47 }
  0x4c   :  { %695 = vmatmul.mubr.msk.f32.gmra.mrb[4].mxu0 %vm99_vm0, %v48_v48 }
  0x4d   :  { %697 = vmatprep.mubr.msk.f32.mxu0 %vm99_vm0, %v49_v49 }
  0x50   :  { %698 = vmatmul.mubr.msk.f32.gmra.mrb[6].mxu0 %vm99_vm0, %v50_v50 }
  0x83   :  { %v72_v53 = vpop.permute.xlu1 %71 }
  0x84   :  { %v62_v52 = vpop.permute.xlu0 %61 }
  0x87   :  { %v77_v55 = vpop.permute.xlu1 %76 }
  0x88   :  { %v67_v54 = vpop.permute.xlu0 %66 }
  0x8e   :  { %v82_v4 = vpop.permute.xlu0 %81 }
  0x8f   :  { %v87_v1 = vpop.permute.xlu1 %86 }
  0x92   :  { %v92_v16 = vpop.permute.xlu0 %91 }
  0x93   :  { %v97_v13 = vpop.permute.xlu1 %96 }
  0x96   :  { %v304_v34 = vpop.permute.xlu0 %303 }
  0x97   :  { %v309_v33 = vpop.permute.xlu1 %308 }
  0x9a   :  { %v314_v37 = vpop.permute.xlu0 %313 }
  0x9b   :  { %v319_v35 = vpop.permute.xlu1 %318 }
  0x9e   :  { %v324_v49 = vpop.permute.xlu0 %323 }
  0x9f   :  { %v329_v46 = vpop.permute.xlu1 %328 }
 0x117   :  { %v690_v56 = vpop.f32.mrb[0].mxu0 }
 0x118   :  { %v244_v57 = vadd.f32 %v690_v56, %v67_v54  ;;  %v238_v58 = vpop.f32.mrb[1].mxu0 }
 0x119   :  { %v239_v59 = vadd.f32 %v238_v58, %v62_v52  ;;  %v339_v58 = vpop.permute.xlu1 %338 }
 0x11a   :  { %v278_v60 = vmax.f32 %v244_v57, 0.0 }
 0x11b   :  { %v277_v61 = vmax.f32 %v239_v59, 0.0  ;;  %v693_v62 = vpop.f32.mrb[2].mxu0 }
 0x11c   :  { %v254_v63 = vadd.f32 %v693_v62, %v77_v55  ;;  %v248_v0 = vpop.f32.mrb[3].mxu0 }
 0x11d   :  { %v249_v2 = vadd.f32 %v248_v0, %v72_v53  ;;  %v795_v3 = vpack.c.bf16 %v278_v60, %v277_v61  ;;  %v334_v61 = vpop.permute.xlu0 %333 }
 0x11e   :  { %v280_v5 = vmax.f32 %v254_v63, 0.0 }
 0x11f   :  { %v279_v6 = vmax.f32 %v249_v2, 0.0  ;;  %v696_v7 = vpop.f32.mrb[4].mxu0  ;;  %796 = vmatprep.subr.bf16.mxu1 %v795_v3 }
 0x120   :  { %v264_v8 = vadd.f32 %v696_v7, %v87_v1  ;;  %v258_v9 = vpop.f32.mrb[5].mxu0  ;;  %798 = vmatpush3.bf16.msra.mxu1 %v795_v3 }
 0x121   :  { %v799_v10 = vpack.c.bf16 %v280_v5, %v279_v6  ;;  %v259_v11 = vadd.f32 %v258_v9, %v82_v4  ;;  %v479_v5 = vld [vmem:[%s1121_s5] sm:$0xff]  ;;  %v484_v6 = vpop.permute.xlu0 %483 }
 0x122   :  { %v282_v12 = vmax.f32 %v264_v8, 0.0 }
 0x123   :  { %v281_v14 = vmax.f32 %v259_v11, 0.0  ;;  %v699_v15 = vpop.f32.mrb[6].mxu0  ;;  %800 = vmatprep.subr.bf16.mxu1 %v799_v10 }
 0x124   :  { %v274_v17 = vadd.f32 %v699_v15, %v97_v13  ;;  %v268_v18 = vpop.f32.mrb[7].mxu0  ;;  %802 = vmatpush3.bf16.msra.mxu1 %v799_v10 }
 0x125   :  { %v803_v19 = vpack.c.bf16 %v282_v12, %v281_v14  ;;  %v269_v20 = vadd.f32 %v268_v18, %v92_v16 }
 0x126   :  { %v284_v21 = vmax.f32 %v274_v17, 0.0 }
 0x127   :  { %v283_v22 = vmax.f32 %v269_v20, 0.0  ;;  %804 = vmatprep.subr.bf16.mxu1 %v803_v19 }
 0x128   :  { %806 = vmatpush3.bf16.msra.mxu1 %v803_v19 }
 0x129   :  { %v807_v23 = vpack.c.bf16 %v284_v21, %v283_v22 }
 0x12b   :  { %808 = vmatprep.subr.bf16.mxu1 %v807_v23 }
 0x12c   :  { %810 = vmatpush3.bf16.msra.mxu1 %v807_v23 }
 0x12d   :  { %811 = vmatprep.subr.bf16.mxu1 %v855_v31 }
 0x12f   :  { %717 = vmatmul.mubr.msk.f32.vlgmr.msra.gmra.mrb[0].mxu1 %vm341_vm2, %v286_v24 }
 0x130   :  { %719 = vmatprep.mubr.msk.f32.mxu1 %vm341_vm2, %v287_v25 }
 0x133   :  { %720 = vmatmul.mubr.msk.f32.gmra.mrb[2].mxu1 %vm341_vm2, %v288_v26 }
 0x134   :  { %722 = vmatprep.mubr.msk.f32.mxu1 %vm341_vm2, %v289_v27 }
 0x137   :  { %723 = vmatmul.mubr.msk.f32.gmra.mrb[4].mxu1 %vm341_vm2, %v290_v28 }
 0x138   :  { %725 = vmatprep.mubr.msk.f32.mxu1 %vm341_vm2, %v291_v29 }
 0x13b   :  { %726 = vmatmul.mubr.msk.f32.gmra.mrb[6].mxu1 %vm341_vm2, %v292_v30 }
 0x13c   :  { %744 = vmatprep.mubr.msk.f32.mxu1 %vm856_vm3, %v857_v32 }
 0x202   :  { %v718_v36 = vpop.f32.mrb[0].mxu1 }
 0x203   :  { %v438_v38 = vadd.f32 %v718_v36, %v309_v33  ;;  %v432_v39 = vpop.f32.mrb[1].mxu1 }
 0x204   :  { %v433_v40 = vadd.f32 %v432_v39, %v304_v34 }
 0x205   :  { %v472_v41 = vmax.f32 %v438_v38, 0.0 }
 0x206   :  { %v471_v42 = vmax.f32 %v433_v40, 0.0  ;;  %v721_v43 = vpop.f32.mrb[2].mxu1 }
 0x207   :  { %v448_v44 = vadd.f32 %v721_v43, %v319_v35  ;;  %v442_v45 = vpop.f32.mrb[3].mxu1 }
 0x208   :  { %v812_v47 = vpack.c.bf16 %v472_v41, %v471_v42  ;;  %v443_v48 = vadd.f32 %v442_v45, %v314_v37 }
 0x209   :  { %v474_v50 = vmax.f32 %v448_v44, 0.0 }
 0x20a   :  { %v473_v51 = vmax.f32 %v443_v48, 0.0  ;;  %v724_v52 = vpop.f32.mrb[4].mxu1  ;;  %813 = vmatpush3.bf16.msra.mxu1 %v812_v47 }
 0x20b   :  { %v458_v53 = vadd.f32 %v724_v52, %v329_v46  ;;  %v452_v54 = vpop.f32.mrb[5].mxu1  ;;  %814 = vmatprep.subr.bf16.mxu1 %v855_v31 }
 0x20c   :  { %v815_v55 = vpack.c.bf16 %v474_v50, %v473_v51  ;;  %v453_v56 = vadd.f32 %v452_v54, %v324_v49 }
 0x20d   :  { %v476_v57 = vmax.f32 %v458_v53, 0.0 }
 0x20e   :  { %v475_v59 = vmax.f32 %v453_v56, 0.0  ;;  %v727_v60 = vpop.f32.mrb[6].mxu1  ;;  %816 = vmatpush3.bf16.msra.mxu1 %v815_v55 }
 0x20f   :  { %v468_v62 = vadd.f32 %v727_v60, %v339_v58  ;;  %v462_v63 = vpop.f32.mrb[7].mxu1  ;;  %817 = vmatprep.subr.bf16.mxu1 %v855_v31 }
 0x210   :  { %v818_v0 = vpack.c.bf16 %v476_v57, %v475_v59  ;;  %v463_v1 = vadd.f32 %v462_v63, %v334_v61 }
 0x211   :  { %v478_v2 = vmax.f32 %v468_v62, 0.0 }
 0x212   :  { %v477_v3 = vmax.f32 %v463_v1, 0.0  ;;  %819 = vmatpush3.bf16.msra.mxu1 %v818_v0 }
 0x213   :  { %820 = vmatprep.subr.bf16.mxu1 %v855_v31 }
 0x214   :  { %v821_v4 = vpack.c.bf16 %v478_v2, %v477_v3 }
 0x216   :  { %822 = vmatpush3.bf16.msra.mxu1 %v821_v4 }
 0x219   :  { %745 = vmatmul.mubr.msk.f32.vlgmr.msra.gmra.mrb[8].mxu1 %vm341_vm2, %v479_v5 }
 0x2ec   :  { %v555_v7 = vpop.f32.mrb[8].mxu1 }
 0x2ed   :  { %v556_v8 = vadd.f32 %v555_v7, %v484_v6  ;;  %v746_v9 = vpop.f32.mrb[9].mxu1 }
 0x2ef   :  { %559 = vst [vmem:[#allocation2] sm:$0xff] %v556_v8 }
 0x2f0   :  { %841 = shalt.err (!%p838_p4)
}
 0x2f1   :  { %s842_s5 = scalar_lea.hbm %s1123_s7, 128 }
 0x2f2   :  { %p843_p5 = scmp.ne.s32.totalorder %s1123_s7, %s842_s5  ;;  %p846_p6 = scmp.lt.u32.totalorder %s842_s5, %s1123_s7 }
 0x2f4   :  { %p848_p7 = pnand %p846_p6, %p843_p5 }
 0x2f6   :  { %851 = shalt.err (!%p848_p7)
}
 0x2f7   :  { %569 = dma.vmem_to_hbm [thread:$0]  %s567_s0, 128, %s1123_s7, [#allocation3]  }
 0x2f8   :  { %852 = dma.done.wait [#allocation3], 128  }
 0x2f9   :  { %853 = vsyncadd [#allocation3], 4294967168 }
 0x2fa   :  { %573 = vsyncpa [#allocation3], 1 }

</bundles_post_ra>
